<compile_context>
chip_gen: v5e
topology: v5e:2x2
jax: 0.10.0
libtpu: 0.0.40
codegen_flags: <defaults>
</compile_context>

<pallas_src>
from functools import partial

import jax
import jax.numpy as jnp
from jax.experimental import pallas as pl
from jax.experimental.pallas import tpu as pltpu


# ----------------------------- Pallas kernel ------------------------------- #

def _fused_tcn_kernel(x_ref, mask_ref, w1t_ref, w1a_ref, b1_ref,
                      w2t_ref, b2_ref, *rest,
                      K, dilation, has_downsample):
    # x_ref   : (Cin, Npad) f32   causal-padded, batch-packed input slab
    # mask_ref: (1, Npad)   f32   1.0 on valid (post-chomp) lanes, 0.0 on pad
    # w1t_ref : ((K-1)*Cmid, Cin) bf16  conv1 taps k=0..K-2 (shifted taps)
    # w1a_ref : (Cmid[+Cout], Cin) bf16 conv1 tap k=K-1 [+ stacked 1x1 downsample]
    # b1_ref  : (Cmid, 1) f32
    # w2t_ref : (K*Cout, Cmid) bf16     conv2 taps k=0..K-1
    # b2_ref  : (Cout, 1) f32
    # [bd_ref : (Cout, 1) f32]          downsample bias (only if has_downsample)
    # o_ref   : (Cout, Npad) f32
    if has_downsample:
        bd_ref, o_ref = rest
    else:
        (o_ref,) = rest

    Cmid = b1_ref.shape[0]
    Cout = b2_ref.shape[0]

    x = x_ref[...]                       # f32 slab
    x_bf = x.astype(jnp.bfloat16)
    mask = mask_ref[...]                 # (1, Npad)

    # ---- conv1: K dilated taps accumulated as shallow bf16 MXU matmuls over
    # lane-rotated views (XLU roll; no lane-offset slice copies, no gathered
    # (K*C, L) slab).  Shift-0 tap also carries the fused 1x1 downsample rows.
    z0 = jnp.dot(w1a_ref[...], x_bf, preferred_element_type=jnp.float32)
    y1 = z0[:Cmid]
    for k in range(K - 1):
        shift = (K - 1 - k) * dilation
        xk = pltpu.roll(x, shift, 1).astype(jnp.bfloat16)
        y1 = y1 + jnp.dot(w1t_ref[k * Cmid:(k + 1) * Cmid, :], xk,
                          preferred_element_type=jnp.float32)

    # chomp1 + causal re-pad of the intermediate, entirely in VMEM:
    # zero the first `pad` lanes of every per-batch segment (no ReLU in net).
    y1pad = (y1 + b1_ref[...]) * mask
    y1_bf = y1pad.astype(jnp.bfloat16)

    # ---- conv2: same rolled-tap accumulation ----
    y2 = jnp.dot(w2t_ref[(K - 1) * Cout:K * Cout, :], y1_bf,
                 preferred_element_type=jnp.float32)
    for k in range(K - 1):
        shift = (K - 1 - k) * dilation
        yk = pltpu.roll(y1pad, shift, 1).astype(jnp.bfloat16)
        y2 = y2 + jnp.dot(w2t_ref[k * Cout:(k + 1) * Cout, :], yk,
                          preferred_element_type=jnp.float32)
    y2 = y2 + b2_ref[...]

    # ---- residual ----
    if has_downsample:
        res = z0[Cmid:] + bd_ref[...]
    else:
        res = x          # Cin == Cout: exact f32 identity, as in PyTorch

    # Lane-dense, unmasked store (Npad is a multiple of 128).
    o_ref[...] = (y2 + res).astype(o_ref.dtype)


# ------------------------------ JAX wrapper --------------------------------- #

def _wn_weight(v, g):
    """weight_norm reparameterization: w = g * v / ||v|| (norm over (Cin, K))."""
    norm = jnp.sqrt(jnp.sum(v * v, axis=(1, 2), keepdims=True))
    return g * v / norm


def temporal_block_last_forward(x_ncw, params, *, kernel_size, dilation):
    """x_ncw: (B, Cin, L) float32, PyTorch NCW layout.  Returns (B, Cout, L)."""
    K = kernel_size
    assert K >= 2, "Chomp1d(padding) requires kernel_size >= 2 (padding > 0)"
    pad = dilation * (K - 1)
    B, Cin, L = x_ncw.shape
    Lseg = L + pad                       # per-batch padded segment length
    N = B * Lseg
    Npad = ((N + 127) // 128) * 128      # lane-dense output width

    # weight_norm -> effective weights (Cout, Cin, K)
    w1 = _wn_weight(params["conv1_v"], params["conv1_g"])
    w2 = _wn_weight(params["conv2_v"], params["conv2_g"])
    Cmid, Cout = w1.shape[0], w2.shape[0]
    has_ds = "down_w" in params

    # conv1 shifted taps k=0..K-2, stacked along rows (tap-major), bf16
    w1t = jnp.transpose(w1, (2, 0, 1))[:K - 1].reshape((K - 1) * Cmid, Cin)
    w1t = w1t.astype(jnp.bfloat16)
    # conv1 shift-0 tap (k = K-1), with the 1x1 downsample fused underneath
    w1_last = w1[:, :, K - 1]                                   # (Cmid, Cin)
    if has_ds:
        w1a = jnp.concatenate([w1_last, params["down_w"][:, :, 0]], axis=0)
    else:
        w1a = w1_last
    w1a = w1a.astype(jnp.bfloat16)
    # conv2 taps, stacked tap-major, bf16
    w2t = jnp.transpose(w2, (2, 0, 1)).reshape(K * Cout, Cmid).astype(jnp.bfloat16)
    b1 = params["conv1_b"][:, None].astype(jnp.float32)
    b2 = params["conv2_b"][:, None].astype(jnp.float32)

    # Causal left-pad each batch, pack batches along the lane axis, pad to Npad.
    xp = jnp.pad(x_ncw.astype(jnp.float32), ((0, 0), (0, 0), (pad, 0)))  # (B,Cin,Lseg)
    xslab = jnp.transpose(xp, (1, 0, 2)).reshape(Cin, N)
    xslab = jnp.pad(xslab, ((0, 0), (0, Npad - N)))

    # Valid-lane mask: 1.0 where the in-segment position >= pad (post-chomp).
    q = jnp.arange(Npad, dtype=jnp.int32) % Lseg
    mask = (q >= pad).astype(jnp.float32)[None, :]               # (1, Npad)

    args = [xslab, mask, w1t, w1a, b1, w2t, b2]
    in_specs = [
        pl.BlockSpec((Cin, Npad), lambda i: (0, 0)),
        pl.BlockSpec((1, Npad), lambda i: (0, 0)),
        pl.BlockSpec(((K - 1) * Cmid, Cin), lambda i: (0, 0)),
        pl.BlockSpec((w1a.shape[0], Cin), lambda i: (0, 0)),
        pl.BlockSpec((Cmid, 1), lambda i: (0, 0)),
        pl.BlockSpec((K * Cout, Cmid), lambda i: (0, 0)),
        pl.BlockSpec((Cout, 1), lambda i: (0, 0)),
    ]
    if has_ds:
        args.append(params["down_b"][:, None].astype(jnp.float32))
        in_specs.append(pl.BlockSpec((Cout, 1), lambda i: (0, 0)))

    out_slab = pl.pallas_call(
        partial(_fused_tcn_kernel, K=K, dilation=dilation, has_downsample=has_ds),
        out_shape=jax.ShapeDtypeStruct((Cout, Npad), jnp.float32),
        grid_spec=pltpu.PrefetchScalarGridSpec(
            num_scalar_prefetch=0,
            grid=(1,),                   # whole batch in one grid step
            in_specs=in_specs,
            out_specs=pl.BlockSpec((Cout, Npad), lambda i: (0, 0)),
        ),
        compiler_params=pltpu.CompilerParams(
            dimension_semantics=("arbitrary",)),
    )(*args)

    # Extract valid lanes: per-batch segments, drop the `pad` causal prefix.
    out = out_slab[:, :N].reshape(Cout, B, Lseg)[:, :, pad:]     # (Cout, B, L)
    return jnp.transpose(out, (1, 0, 2)).astype(x_ncw.dtype)


# ------------------------------- reference ---------------------------------- #

def _ref_causal_conv(x_nlc, w_kio, b, *, dilation):
    B, L, _ = x_nlc.shape
    K = w_kio.shape[0]
    pad = dilation * (K - 1)
    xp = jnp.pad(x_nlc, ((0, 0), (pad, 0), (0, 0)))
    out = jnp.zeros((B, L, w_kio.shape[-1]), jnp.float32)
    for k in range(K):
        out = out + jnp.einsum("blc,cd->bld",
                               xp[:, k * dilation: k * dilation + L, :], w_kio[k])
    return out + b


def _ref_forward(x_ncw, params, *, kernel_size, dilation):
    w1 = jnp.transpose(_wn_weight(params["conv1_v"], params["conv1_g"]), (2, 1, 0))
    w2 = jnp.transpose(_wn_weight(params["conv2_v"], params["conv2_g"]), (2, 1, 0))
    x_nlc = jnp.transpose(x_ncw, (0, 2, 1))
    y1 = _ref_causal_conv(x_nlc, w1, params["conv1_b"], dilation=dilation)
    y2 = _ref_causal_conv(y1, w2, params["conv2_b"], dilation=dilation)
    if "down_w" in params:
        res = jnp.einsum("blc,dc->bld", x_nlc, params["down_w"][:, :, 0]) + params["down_b"]
    else:
        res = x_nlc
    return jnp.transpose(y2 + res, (0, 2, 1))


# --------------------------------- main -------------------------------------- #

if __name__ == "__main__":
    # Module hyperparameters (small, TCN-style causal block).
    n_inputs, n_outputs = 8, 16
    kernel_size, stride, dilation = 3, 1, 2
    B, L = 2, 32

    key = jax.random.PRNGKey(0)
    ks = jax.random.split(key, 9)

    # Deterministic synthetic parameters mirroring init_weights() shapes/scales.
    conv1_v = (jax.random.normal(ks[0], (n_outputs, n_inputs, kernel_size)) * 0.001
               ).at[:, 0, :].add(1.0 / kernel_size).astype(jnp.float32)
    conv2_v = (jax.random.normal(ks[1], (n_outputs, n_outputs, kernel_size)) * 0.001
               + 1.0 / kernel_size).astype(jnp.float32)
    params = {
        "conv1_v": conv1_v,
        "conv1_g": jnp.abs(jax.random.normal(ks[2], (n_outputs, 1, 1))).astype(jnp.float32) + 0.5,
        "conv1_b": (jax.random.normal(ks[3], (n_outputs,)) * 1e-6).astype(jnp.float32),
        "conv2_v": conv2_v,
        "conv2_g": jnp.abs(jax.random.normal(ks[4], (n_outputs, 1, 1))).astype(jnp.float32) + 0.5,
        "conv2_b": (jax.random.normal(ks[5], (n_outputs,)) * 1e-6).astype(jnp.float32),
        # downsample exists because n_inputs != n_outputs
        "down_w": (jax.random.normal(ks[6], (n_outputs, n_inputs, 1)) * 0.1).astype(jnp.float32),
        "down_b": jnp.zeros((n_outputs,), jnp.float32),
    }

    x = jax.random.normal(ks[7], (B, n_inputs, L), dtype=jnp.float32)  # NCW like PyTorch

    out = temporal_block_last_forward(x, params, kernel_size=kernel_size, dilation=dilation)
    out = jax.block_until_ready(out)

    ref = _ref_forward(x, params, kernel_size=kernel_size, dilation=dilation)
    assert out.shape == (B, n_outputs, L)
    # Tolerance widened (vs f32 reference) for the bf16 MXU operands; accumulation
    # stays f32, so the drift is bounded by bf16 rounding of weights/activations.
    assert jnp.allclose(out, ref, atol=1e-1, rtol=5e-2), "mismatch vs JAX reference"

    # TODO(synk): dropout1/dropout2 are inference-mode identity; relu/relu1/relu2
    # are defined in the PyTorch module but never applied in forward().
    print("KERNEL_OK")
</pallas_src>

<mosaic_0001>
module attributes {stable_mosaic.version = 11 : i64} {
  func.func @_fused_tcn_kernel(%arg0: i32, %arg1: memref<8x128xf32, #tpu.memory_space<vmem>>, %arg2: memref<1x128xf32, #tpu.memory_space<vmem>>, %arg3: memref<32x8xbf16, #tpu.memory_space<vmem>>, %arg4: memref<32x8xbf16, #tpu.memory_space<vmem>>, %arg5: memref<16x1xf32, #tpu.memory_space<vmem>>, %arg6: memref<48x16xbf16, #tpu.memory_space<vmem>>, %arg7: memref<16x1xf32, #tpu.memory_space<vmem>>, %arg8: memref<16x1xf32, #tpu.memory_space<vmem>>, %arg9: memref<16x128xf32, #tpu.memory_space<vmem>>) attributes {dimension_semantics = [#tpu.dimension_semantics<arbitrary>], iteration_bounds = array<i64: 1>, scalar_prefetch = 0 : i64, scratch_operands = 0 : i64, tpu.core_type = #tpu.core_type<tc>, window_params = [{pipeline_mode = #tpu.pipeline_mode<synchronous>, transform_indices = @transform_0, window_bounds = array<i64: 8, 128>}, {pipeline_mode = #tpu.pipeline_mode<synchronous>, transform_indices = @transform_1, window_bounds = array<i64: 1, 128>}, {pipeline_mode = #tpu.pipeline_mode<synchronous>, transform_indices = @transform_2, window_bounds = array<i64: 32, 8>}, {pipeline_mode = #tpu.pipeline_mode<synchronous>, transform_indices = @transform_3, window_bounds = array<i64: 32, 8>}, {pipeline_mode = #tpu.pipeline_mode<synchronous>, transform_indices = @transform_4, window_bounds = array<i64: 16, 1>}, {pipeline_mode = #tpu.pipeline_mode<synchronous>, transform_indices = @transform_5, window_bounds = array<i64: 48, 16>}, {pipeline_mode = #tpu.pipeline_mode<synchronous>, transform_indices = @transform_6, window_bounds = array<i64: 16, 1>}, {pipeline_mode = #tpu.pipeline_mode<synchronous>, transform_indices = @transform_7, window_bounds = array<i64: 16, 1>}, {pipeline_mode = #tpu.pipeline_mode<synchronous>, transform_indices = @transform_8, window_bounds = array<i64: 16, 128>}]} {
    %c0 = arith.constant 0 : index
    %c0_0 = arith.constant 0 : index
    %0 = vector.load %arg1[%c0, %c0_0] : memref<8x128xf32, #tpu.memory_space<vmem>>, vector<8x128xf32>
    %1 = arith.truncf %0 : vector<8x128xf32> to vector<8x128xbf16>
    %c0_1 = arith.constant 0 : index
    %c0_2 = arith.constant 0 : index
    %2 = vector.load %arg2[%c0_1, %c0_2] : memref<1x128xf32, #tpu.memory_space<vmem>>, vector<1x128xf32>
    %c0_3 = arith.constant 0 : index
    %c0_4 = arith.constant 0 : index
    %3 = vector.load %arg4[%c0_3, %c0_4] : memref<32x8xbf16, #tpu.memory_space<vmem>>, vector<32x8xbf16>
    %cst = arith.constant dense<0.000000e+00> : vector<32x128xf32>
    %4 = tpu.matmul %3, %1, %cst {dimension_numbers = #tpu.dot_dimension_numbers<[1], [0], [0], [1], [0, 0, 1, 1], [], []>} : vector<32x8xbf16>, vector<8x128xbf16>, vector<32x128xf32> -> vector<32x128xf32>
    %5 = vector.extract_strided_slice %4 {offsets = [0, 0], sizes = [16, 128], strides = [1, 1]} : vector<32x128xf32> to vector<16x128xf32>
    %c4_i32 = arith.constant 4 : i32
    %6 = tpu.dynamic_rotate %0 by %c4_i32 dim 1 : vector<8x128xf32>, i32 -> vector<8x128xf32>
    %7 = arith.truncf %6 : vector<8x128xf32> to vector<8x128xbf16>
    %c0_5 = arith.constant 0 : index
    %c0_6 = arith.constant 0 : index
    %8 = vector.load %arg3[%c0_5, %c0_6] : memref<32x8xbf16, #tpu.memory_space<vmem>>, vector<16x8xbf16>
    %cst_7 = arith.constant dense<0.000000e+00> : vector<16x128xf32>
    %9 = tpu.matmul %8, %7, %cst_7 {dimension_numbers = #tpu.dot_dimension_numbers<[1], [0], [0], [1], [0, 0, 1, 1], [], []>} : vector<16x8xbf16>, vector<8x128xbf16>, vector<16x128xf32> -> vector<16x128xf32>
    %10 = arith.addf %5, %9 : vector<16x128xf32>
    %c2_i32 = arith.constant 2 : i32
    %11 = tpu.dynamic_rotate %0 by %c2_i32 dim 1 : vector<8x128xf32>, i32 -> vector<8x128xf32>
    %12 = arith.truncf %11 : vector<8x128xf32> to vector<8x128xbf16>
    %c16 = arith.constant 16 : index
    %c0_8 = arith.constant 0 : index
    %13 = vector.load %arg3[%c16, %c0_8] : memref<32x8xbf16, #tpu.memory_space<vmem>>, vector<16x8xbf16>
    %cst_9 = arith.constant dense<0.000000e+00> : vector<16x128xf32>
    %14 = tpu.matmul %13, %12, %cst_9 {dimension_numbers = #tpu.dot_dimension_numbers<[1], [0], [0], [1], [0, 0, 1, 1], [], []>} : vector<16x8xbf16>, vector<8x128xbf16>, vector<16x128xf32> -> vector<16x128xf32>
    %15 = arith.addf %10, %14 : vector<16x128xf32>
    %c0_10 = arith.constant 0 : index
    %c0_11 = arith.constant 0 : index
    %16 = vector.load %arg5[%c0_10, %c0_11] : memref<16x1xf32, #tpu.memory_space<vmem>>, vector<16x1xf32>
    %17 = vector.broadcast %16 : vector<16x1xf32> to vector<16x128xf32>
    %18 = arith.addf %15, %17 : vector<16x128xf32>
    %19 = vector.broadcast %2 : vector<1x128xf32> to vector<16x128xf32>
    %20 = arith.mulf %18, %19 : vector<16x128xf32>
    %21 = arith.truncf %20 : vector<16x128xf32> to vector<16x128xbf16>
    %c32 = arith.constant 32 : index
    %c0_12 = arith.constant 0 : index
    %22 = vector.load %arg6[%c32, %c0_12] : memref<48x16xbf16, #tpu.memory_space<vmem>>, vector<16x16xbf16>
    %cst_13 = arith.constant dense<0.000000e+00> : vector<16x128xf32>
    %23 = tpu.matmul %22, %21, %cst_13 {dimension_numbers = #tpu.dot_dimension_numbers<[1], [0], [0], [1], [0, 0, 1, 1], [], []>} : vector<16x16xbf16>, vector<16x128xbf16>, vector<16x128xf32> -> vector<16x128xf32>
    %c4_i32_14 = arith.constant 4 : i32
    %24 = tpu.dynamic_rotate %20 by %c4_i32_14 dim 1 : vector<16x128xf32>, i32 -> vector<16x128xf32>
    %25 = arith.truncf %24 : vector<16x128xf32> to vector<16x128xbf16>
    %c0_15 = arith.constant 0 : index
    %c0_16 = arith.constant 0 : index
    %26 = vector.load %arg6[%c0_15, %c0_16] : memref<48x16xbf16, #tpu.memory_space<vmem>>, vector<16x16xbf16>
    %cst_17 = arith.constant dense<0.000000e+00> : vector<16x128xf32>
    %27 = tpu.matmul %26, %25, %cst_17 {dimension_numbers = #tpu.dot_dimension_numbers<[1], [0], [0], [1], [0, 0, 1, 1], [], []>} : vector<16x16xbf16>, vector<16x128xbf16>, vector<16x128xf32> -> vector<16x128xf32>
    %28 = arith.addf %23, %27 : vector<16x128xf32>
    %c2_i32_18 = arith.constant 2 : i32
    %29 = tpu.dynamic_rotate %20 by %c2_i32_18 dim 1 : vector<16x128xf32>, i32 -> vector<16x128xf32>
    %30 = arith.truncf %29 : vector<16x128xf32> to vector<16x128xbf16>
    %c16_19 = arith.constant 16 : index
    %c0_20 = arith.constant 0 : index
    %31 = vector.load %arg6[%c16_19, %c0_20] : memref<48x16xbf16, #tpu.memory_space<vmem>>, vector<16x16xbf16>
    %cst_21 = arith.constant dense<0.000000e+00> : vector<16x128xf32>
    %32 = tpu.matmul %31, %30, %cst_21 {dimension_numbers = #tpu.dot_dimension_numbers<[1], [0], [0], [1], [0, 0, 1, 1], [], []>} : vector<16x16xbf16>, vector<16x128xbf16>, vector<16x128xf32> -> vector<16x128xf32>
    %33 = arith.addf %28, %32 : vector<16x128xf32>
    %c0_22 = arith.constant 0 : index
    %c0_23 = arith.constant 0 : index
    %34 = vector.load %arg7[%c0_22, %c0_23] : memref<16x1xf32, #tpu.memory_space<vmem>>, vector<16x1xf32>
    %35 = vector.broadcast %34 : vector<16x1xf32> to vector<16x128xf32>
    %36 = arith.addf %33, %35 : vector<16x128xf32>
    %37 = vector.extract_strided_slice %4 {offsets = [16, 0], sizes = [16, 128], strides = [1, 1]} : vector<32x128xf32> to vector<16x128xf32>
    %c0_24 = arith.constant 0 : index
    %c0_25 = arith.constant 0 : index
    %38 = vector.load %arg8[%c0_24, %c0_25] : memref<16x1xf32, #tpu.memory_space<vmem>>, vector<16x1xf32>
    %39 = vector.broadcast %38 : vector<16x1xf32> to vector<16x128xf32>
    %40 = arith.addf %37, %39 : vector<16x128xf32>
    %41 = arith.addf %36, %40 : vector<16x128xf32>
    %c0_26 = arith.constant 0 : index
    %c0_27 = arith.constant 0 : index
    %42 = vector.load %arg9[%c0_26, %c0_27] : memref<16x128xf32, #tpu.memory_space<vmem>>, vector<16x128xf32>
    tpu.vector_store %arg9[%c0_26, %c0_27], %41 {strides = array<i32>} : memref<16x128xf32, #tpu.memory_space<vmem>>, vector<16x128xf32>,
    return
  }
  func.func @transform_0(%arg0: i32) -> (i32, i32) {
    %c0_i32 = arith.constant 0 : i32
    %c0_i32_0 = arith.constant 0 : i32
    %c0_i32_1 = arith.constant 0 : i32
    return %c0_i32, %c0_i32_0 : i32, i32
  }
  func.func @transform_1(%arg0: i32) -> (i32, i32) {
    %c0_i32 = arith.constant 0 : i32
    %c0_i32_0 = arith.constant 0 : i32
    %c0_i32_1 = arith.constant 0 : i32
    return %c0_i32, %c0_i32_0 : i32, i32
  }
  func.func @transform_2(%arg0: i32) -> (i32, i32) {
    %c0_i32 = arith.constant 0 : i32
    %c0_i32_0 = arith.constant 0 : i32
    %c0_i32_1 = arith.constant 0 : i32
    return %c0_i32, %c0_i32_0 : i32, i32
  }
  func.func @transform_3(%arg0: i32) -> (i32, i32) {
    %c0_i32 = arith.constant 0 : i32
    %c0_i32_0 = arith.constant 0 : i32
    %c0_i32_1 = arith.constant 0 : i32
    return %c0_i32, %c0_i32_0 : i32, i32
  }
  func.func @transform_4(%arg0: i32) -> (i32, i32) {
    %c0_i32 = arith.constant 0 : i32
    %c0_i32_0 = arith.constant 0 : i32
    %c0_i32_1 = arith.constant 0 : i32
    return %c0_i32, %c0_i32_0 : i32, i32
  }
  func.func @transform_5(%arg0: i32) -> (i32, i32) {
    %c0_i32 = arith.constant 0 : i32
    %c0_i32_0 = arith.constant 0 : i32
    %c0_i32_1 = arith.constant 0 : i32
    return %c0_i32, %c0_i32_0 : i32, i32
  }
  func.func @transform_6(%arg0: i32) -> (i32, i32) {
    %c0_i32 = arith.constant 0 : i32
    %c0_i32_0 = arith.constant 0 : i32
    %c0_i32_1 = arith.constant 0 : i32
    return %c0_i32, %c0_i32_0 : i32, i32
  }
  func.func @transform_7(%arg0: i32) -> (i32, i32) {
    %c0_i32 = arith.constant 0 : i32
    %c0_i32_0 = arith.constant 0 : i32
    %c0_i32_1 = arith.constant 0 : i32
    return %c0_i32, %c0_i32_0 : i32, i32
  }
  func.func @transform_8(%arg0: i32) -> (i32, i32) {
    %c0_i32 = arith.constant 0 : i32
    %c0_i32_0 = arith.constant 0 : i32
    %c0_i32_1 = arith.constant 0 : i32
    return %c0_i32, %c0_i32_0 : i32, i32
  }
}

</mosaic_0001>

<bundles_post_ra>
// kernel: tpu_custom_call.1
= control target key start
LH: loop header
LB: loop body
LE: loop exit
PB: predicated region body
PF: predicated region fallthrough
CT: control target
= control target key end

     0   :  { %vm55_vm0 = vcmask 1043456   ;;  %s385_s29 = smov 2   ;;  %s498_s0 = inlined_call_operand.vmem [shape: f32[8,128], index: 0, kind: input, shape index: {}]   ;;  %s499_s1 = inlined_call_operand.vmem [shape: f32[1,128], index: 1, kind: input, shape index: {}]   ;;  %s500_s2 = inlined_call_operand.vmem [shape: bf16[32,8], index: 2, kind: input, shape index: {}]   ;;  %s501_s3 = inlined_call_operand.vmem [shape: bf16[32,8], index: 3, kind: input, shape index: {}]   ;;  %s502_s4 = inlined_call_operand.vmem [shape: f32[16,1], index: 4, kind: input, shape index: {}]   ;;  %s503_s5 = inlined_call_operand.vmem [shape: bf16[48,16], index: 5, kind: input, shape index: {}]   ;;  %s504_s6 = inlined_call_operand.vmem [shape: f32[16,1], index: 6, kind: input, shape index: {}]   ;;  %s505_s7 = inlined_call_operand.vmem [shape: f32[16,1], index: 7, kind: input, shape index: {}]   ;;  %s506_s8 = inlined_call_operand.hbm [shape: f32[16,128], index: 8, kind: output, shape index: {}]  }
   0x1   :  { %v31_v0 = vld [vmem:[%s498_s0] sm:$0xff] }
   0x2   :  { %110 = vrot.lane.b32.xlu0 %v31_v0, %s385_s29  ;;  %v32_v1 = vpack.c.bf16 %v31_v0, %v31_v0 }
   0x3   :  { %13 = vsyncpa [#allocation3], 0  ;;  %v332_v3 = vld [vmem:[%s501_s3] sm:$0xff]  ;;  %vm48_vm1 = vcmask 64512   ;;  %s386_s10 = smov 4   ;;  %v387_v5 = vmov 0  }
   0x4   :  { %v57_v2 = vsel %vm55_vm0, %v32_v1, 0  ;;  %v142_v4 = vld [vmem:[%s502_s4] sm:$0xff]  ;;  %345 = vset.pattern.permute.xlu1 %v387_v5  ;;  %356 = vset.pattern.permute.xlu0 %v387_v5  ;;  %v333_v6 = vld [vmem:[%s501_s3 + $0x8] sm:$0xff]  ;;  %v336_v37 = vld [vmem:[%s503_s5 + $0x10] sm:$0xff]  ;;  %vm176_vm2 = vcmask 130048   ;;  %s285_s0 = sshll.u32 %s506_s8, 4  ;;  %s286_s0 = int_to_ptr.hbm [resolvable:$true] %s285_s0 }
   0x5   :  { %66 = vmatpush.bf16.msra.mxu0 %v57_v2  ;;  %146 = vperm.xlu1 %345, %v142_v4   ;;  %v143_v7 = vld [vmem:[%s502_s4 + $0x8] sm:$0xff]  ;;  %v334_v17 = vld [vmem:[%s500_s2] sm:$0xff]  ;;  %s389_s11 = smov 128   ;;  %s390_s12 = smov 8  }
   0x6   :  { %357 = vset.pattern.permute.xlu2 %v387_v5  ;;  %v248_v8 = vld [vmem:[%s504_s6 + $0x8] sm:$0xff]  ;;  %v358_v30 = vld [vmem:[%s499_s1] ss:$0 sm:$0xff] }
   0x7   :  { %v262_v9 = vld [vmem:[%s505_s7 + $0x8] sm:$0xff]  ;;  %v247_v38 = vld [vmem:[%s504_s6] sm:$0xff] }
   0x8   :  { %305 = vmatmul.msk.bf16.vlgmr.msra.gmra.mxu0 %vm48_vm1, %v332_v3  ;;  %v335_v13 = vld [vmem:[%s500_s2 + $0x8] sm:$0xff]  ;;  %v261_v39 = vld [vmem:[%s505_s7] sm:$0xff] }
   0x9   :  { %v337_v44 = vld [vmem:[%s503_s5] sm:$0xff]  ;;  %v338_v49 = vld [vmem:[%s503_s5 + $0x8] sm:$0xff]  ;;  %s388_s5 = smov [#allocation2]  }
   0xa   :  { %78 = vrot.lane.b32.xlu0 %v31_v0, %s386_s10  ;;  %s283_s7 = sshll.u32 %s388_s5, 4  ;;  %s284_s7 = int_to_ptr.vmem [resolvable:$true] %s283_s7 }
   0xd   :  { %151 = vperm.xlu1 %345, %v143_v7  }
  0x12   :  { %251 = vperm.xlu0 %356, %v247_v38  }
  0x15   :  { %256 = vperm.xlu1 %345, %v248_v8  }
  0x18   :  { %306 = vmatmul.msk.bf16.gmra.mxu0 %vm48_vm1, %v333_v6 }
  0x1d   :  { %270 = vperm.xlu1 %345, %v262_v9  }
  0x74   :  { %v111_v10 = vpop.permute.xlu0 %110 }
  0x75   :  { %v112_v11 = vpack.c.bf16 %v111_v10, %v111_v10 }
  0x77   :  { %v124_v12 = vsel %vm55_vm0, %v112_v11, 0  ;;  %v147_v21 = vpop.permute.xlu1 %146 }
  0x78   :  { %133 = vmatpush.bf16.msra.mxu2 %v124_v12 }
  0x7b   :  { %316 = vmatmul.msk.bf16.vlgmr.msra.gmra.mxu2 %vm48_vm1, %v335_v13 }
  0x7c   :  { %v79_v14 = vpop.permute.xlu0 %78 }
  0x7d   :  { %v80_v15 = vpack.c.bf16 %v79_v14, %v79_v14 }
  0x7f   :  { %v92_v16 = vsel %vm55_vm0, %v80_v15, 0  ;;  %v152_v31 = vpop.permute.xlu1 %151 }
  0x80   :  { %101 = vmatpush.bf16.msra.mxu1 %v92_v16 }
  0x83   :  { %311 = vmatmul.msk.bf16.vlgmr.msra.gmra.mxu1 %vm48_vm1, %v334_v17 }
  0x84   :  { %v252_v57 = vpop.permute.xlu0 %251 }
  0x85   :  { %v68_v18 = vpop.f32.mrf.mxu0 }
  0x87   :  { %v257_v52 = vpop.permute.xlu1 %256 }
  0x8d   :  { %v70_v24 = vpop.f32.mrf.mxu0 }
  0x8f   :  { %v271_v0 = vpop.permute.xlu1 %270 }
  0x95   :  { %v73_v54 = vpop.f32.mrf.mxu0 }
  0x9d   :  { %v75_v2 = vpop.f32.mrf.mxu0 }
  0x9e   :  { %v274_v5 = vadd.f32 %v271_v0, %v75_v2 }
  0xfe   :  { %v135_v19 = vpop.f32.mrf.mxu2 }
 0x100   :  { %v103_v20 = vpop.f32.mrf.mxu1 }
 0x101   :  { %v108_v22 = vadd.f32 %v103_v20, %v68_v18 }
 0x103   :  { %v140_v23 = vadd.f32 %v135_v19, %v108_v22 }
 0x105   :  { %v154_v28 = vadd.f32 %v147_v21, %v140_v23 }
 0x106   :  { %v137_v27 = vpop.f32.mrf.mxu2 }
 0x107   :  { %v159_v33 = vmul.f32 %v358_v30, %v154_v28 }
 0x108   :  { %v105_v25 = vpop.f32.mrf.mxu1 }
 0x109   :  { %v109_v26 = vadd.f32 %v105_v25, %v70_v24 }
 0x10b   :  { %v141_v29 = vadd.f32 %v137_v27, %v109_v26 }
 0x10d   :  { %v155_v32 = vadd.f32 %v152_v31, %v141_v29 }
 0x10f   :  { %v160_v34 = vmul.f32 %v358_v30, %v155_v32 }
 0x111   :  { %v346_v35 = vpack.i.bf16 %v160_v34, %v159_v33  ;;  %v161_v36 = vpack.c.bf16 %v160_v34, %v159_v33 }
 0x113   :  { %347 = vrot.lane.b32.xlu2 %v346_v35, %s386_s10  ;;  %209 = vmatpush.bf16.msrb.mxu1 %v161_v36 }
 0x116   :  { %326 = vmatmul.msk.bf16.vlgmr.msrb.gmra.mxu1 %vm176_vm2, %v336_v37 }
 0x11b   :  { %352 = vrot.lane.b32.xlu2 %v346_v35, %s385_s29 }
 0x123   :  { %265 = vperm.xlu2 %357, %v261_v39  }
 0x16d   :  { %v348_v40 = vpop.permute.xlu2 %347 }
 0x16e   :  { %v350_v41 = vunpack.i.h.bf16 %v348_v40  ;;  %v349_v42 = vunpack.i.l.bf16 %v348_v40 }
 0x170   :  { %v168_v43 = vpack.c.bf16 %v350_v41, %v349_v42 }
 0x172   :  { %187 = vmatpush.bf16.msra.mxu3 %v168_v43 }
 0x175   :  { %v353_v45 = vpop.permute.xlu2 %352  ;;  %321 = vmatmul.msk.bf16.vlgmr.msra.gmra.mxu3 %vm176_vm2, %v337_v44 }
 0x176   :  { %v355_v46 = vunpack.i.h.bf16 %v353_v45  ;;  %v354_v47 = vunpack.i.l.bf16 %v353_v45 }
 0x178   :  { %v220_v48 = vpack.c.bf16 %v355_v46, %v354_v47 }
 0x17a   :  { %238 = vmatpush.bf16.msrb.mxu2 %v220_v48 }
 0x17d   :  { %331 = vmatmul.msk.bf16.vlgmr.msrb.gmra.mxu2 %vm176_vm2, %v338_v49  ;;  %v266_v55 = vpop.permute.xlu2 %265 }
 0x17e   :  { %v273_v59 = vadd.f32 %v266_v55, %v73_v54 }
 0x193   :  { %v211_v51 = vpop.f32.mrf.mxu1 }
 0x19b   :  { %v213_v63 = vpop.f32.mrf.mxu1 }
 0x1f8   :  { %v189_v50 = vpop.f32.mrf.mxu3 }
 0x1f9   :  { %v212_v53 = vadd.f32 %v211_v51, %v189_v50 }
 0x200   :  { %v240_v56 = vpop.f32.mrf.mxu2  ;;  %v191_v61 = vpop.f32.mrf.mxu3 }
 0x201   :  { %v245_v58 = vadd.f32 %v240_v56, %v212_v53  ;;  %v214_v1 = vadd.f32 %v213_v63, %v191_v61 }
 0x203   :  { %v259_v60 = vadd.f32 %v252_v57, %v245_v58 }
 0x205   :  { %v275_v62 = vadd.f32 %v273_v59, %v259_v60 }
 0x207   :  { %277 = vst [vmem:[#allocation2] sm:$0xff] %v275_v62 }
 0x208   :  { %v242_v3 = vpop.f32.mrf.mxu2 }
 0x209   :  { %v246_v4 = vadd.f32 %v242_v3, %v214_v1 }
 0x20b   :  { %v260_v6 = vadd.f32 %v257_v52, %v246_v4 }
 0x20d   :  { %v276_v7 = vadd.f32 %v274_v5, %v260_v6 }
 0x20f   :  { %278 = vst [vmem:[#allocation2 + $0x8] sm:$0xff] %v276_v7 }
 0x210   :  { %291 = dma.vmem_to_hbm [thread:$0]  %s284_s7, 256, %s286_s0, [#allocation3], %s389_s11, %s389_s11, %s390_s12  }
 0x211   :  { %383 = dma.done.wait [#allocation3], 256  }
 0x212   :  { %384 = vsyncadd [#allocation3], 4294967040 }
 0x213   :  { %296 = vsyncpa [#allocation3], 1 }

</bundles_post_ra>
